<compile_context>
chip_gen: v7x
topology: tpu7x:2x2x1
jax: 0.10.0
libtpu: 0.0.40
codegen_flags: <defaults>
</compile_context>

<pallas_src>
import jax
import jax.numpy as jnp
from jax.experimental import pallas as pl
from jax.experimental.pallas import tpu as pltpu


def _round_up(x: int, m: int) -> int:
    return ((x + m - 1) // m) * m


def _make_mlp_kernel(num_layers: int):
    """Push one (TM, C)/(TM, E) row tile through every layer, all in VMEM."""

    def kernel(c_ref, e_ref, *refs):
        # refs = (w0c, w0e, b0, w1, b1, ..., w_{L-1}, b_{L-1}, o_ref)
        o_ref = refs[-1]

        # Layer 0 with fused concat: cat(c, e) @ W0 + b0 == c @ W0c + e @ W0e + b0.
        h = (
            jnp.dot(c_ref[...].astype(jnp.float32), refs[0][...],
                    preferred_element_type=jnp.float32)
            + jnp.dot(e_ref[...].astype(jnp.float32), refs[1][...],
                      preferred_element_type=jnp.float32)
            + refs[2][...]
        )
        h = jnp.maximum(h, 0.0)  # ReLU (layer_class activation)

        # Remaining hidden layers.
        for l in range(1, num_layers):
            w = refs[3 + 2 * (l - 1)][...]      # [H, H]  VMEM-resident
            b = refs[3 + 2 * (l - 1) + 1][...]  # [1, H]  broadcast over rows
            h = jnp.dot(h, w, preferred_element_type=jnp.float32) + b
            h = jnp.maximum(h, 0.0)

        o_ref[...] = h.astype(o_ref.dtype)

    return kernel


def mlp_forward(coords, embed, weights, biases, *, tile_m: int = 512):
    """coords: [N, C]; embed: [N, E]; weights[0]: [C+E, H]; weights[l>0]: [H, H]."""
    coords = coords.astype(jnp.float32)
    embed = embed.astype(jnp.float32)

    M, C = coords.shape
    _, E = embed.shape
    num_layers = len(weights)
    H = weights[-1].shape[1]

    # Row tile: multiple of 8 (sublane rule), capped by padded M.
    TM = min(_round_up(tile_m, 8), _round_up(M, 8))
    Mp = _round_up(M, TM)
    if Mp != M:
        coords = jnp.pad(coords, ((0, Mp - M), (0, 0)))
        embed = jnp.pad(embed, ((0, Mp - M), (0, 0)))

    # Split first-layer weight so the concat is fused into the kernel.
    w0 = weights[0].astype(jnp.float32)
    w0c, w0e = w0[:C], w0[C:]

    # Weights / biases: full-extent blocks with constant index_map ->
    # DMA'd to VMEM once, resident for all grid steps.
    wb_args = [w0c, w0e, biases[0].reshape(1, -1).astype(jnp.float32)]
    for w, b in zip(weights[1:], biases[1:]):
        wb_args += [w.astype(jnp.float32), b.reshape(1, -1).astype(jnp.float32)]
    wb_specs = [pl.BlockSpec(a.shape, lambda i: (0, 0)) for a in wb_args]

    out = pl.pallas_call(
        _make_mlp_kernel(num_layers),
        out_shape=jax.ShapeDtypeStruct((Mp, H), jnp.float32),
        grid=(Mp // TM,),
        in_specs=[
            pl.BlockSpec((TM, C), lambda i: (i, 0)),
            pl.BlockSpec((TM, E), lambda i: (i, 0)),
        ] + wb_specs,
        out_specs=pl.BlockSpec((TM, H), lambda i: (i, 0)),
        compiler_params=pltpu.CompilerParams(
            dimension_semantics=("parallel",),   # v7x: shard rows over 2 TCs
            vmem_limit_bytes=32 * 1024 * 1024,   # raise v5e's 16 MiB default
        ),
    )(coords, embed, *wb_args)

    return out[:M]


if __name__ == "__main__":
    # Small shapes consistent with the module.
    coord_size, embed_size = 2, 30          # first-layer input size = 32
    hidden_size = 32
    num_hidden_layers = 3
    N = 200                                  # rows of the (conceptually) concatenated input

    key = jax.random.PRNGKey(0)
    k_coord, k_embed, k_params = jax.random.split(key, 3)

    coords = jax.random.normal(k_coord, (N, coord_size), dtype=jnp.float32)
    embed = jax.random.normal(k_embed, (N, embed_size), dtype=jnp.float32)

    # Deterministic "nn.Linear" params: uniform(-1/sqrt(fan_in), 1/sqrt(fan_in)).
    in_sizes = [coord_size + embed_size] + [hidden_size] * (num_hidden_layers - 1)
    weights, biases = [], []
    for d_in in in_sizes:
        kw, kb, k_params = jax.random.split(k_params, 3)
        bound = 1.0 / (d_in ** 0.5)
        weights.append(jax.random.uniform(
            kw, (d_in, hidden_size), minval=-bound, maxval=bound, dtype=jnp.float32))
        biases.append(jax.random.uniform(
            kb, (hidden_size,), minval=-bound, maxval=bound, dtype=jnp.float32))

    out = mlp_forward(coords, embed, weights, biases, tile_m=64)
    out = jax.block_until_ready(out)

    # Pure-JAX reference: same math as the torch module with Linear+ReLU layers.
    ref = jnp.concatenate([coords, embed], axis=1)
    for w, b in zip(weights, biases):
        ref = jnp.maximum(ref @ w + b, 0.0)

    assert out.shape == (N, hidden_size), out.shape
    assert jnp.allclose(out, ref, atol=1e-4, rtol=1e-4), float(
        jnp.max(jnp.abs(out - ref)))

    print("KERNEL_OK")
</pallas_src>

<mosaic_0001>
module attributes {stable_mosaic.version = 11 : i64} {
  func.func @kernel(%arg0: i32, %arg1: memref<64x2xf32, #tpu.memory_space<vmem>>, %arg2: memref<64x30xf32, #tpu.memory_space<vmem>>, %arg3: memref<2x32xf32, #tpu.memory_space<vmem>>, %arg4: memref<30x32xf32, #tpu.memory_space<vmem>>, %arg5: memref<1x32xf32, #tpu.memory_space<vmem>>, %arg6: memref<32x32xf32, #tpu.memory_space<vmem>>, %arg7: memref<1x32xf32, #tpu.memory_space<vmem>>, %arg8: memref<32x32xf32, #tpu.memory_space<vmem>>, %arg9: memref<1x32xf32, #tpu.memory_space<vmem>>, %arg10: memref<64x32xf32, #tpu.memory_space<vmem>>) attributes {dimension_semantics = [#tpu.dimension_semantics<parallel>], iteration_bounds = array<i64: 4>, scalar_prefetch = 0 : i64, scratch_operands = 0 : i64, tpu.core_type = #tpu.core_type<tc>, window_params = [{transform_indices = @transform_0, window_bounds = array<i64: 64, 2>}, {transform_indices = @transform_1, window_bounds = array<i64: 64, 30>}, {pipeline_mode = #tpu.pipeline_mode<synchronous>, transform_indices = @transform_2, window_bounds = array<i64: 2, 32>}, {pipeline_mode = #tpu.pipeline_mode<synchronous>, transform_indices = @transform_3, window_bounds = array<i64: 30, 32>}, {pipeline_mode = #tpu.pipeline_mode<synchronous>, transform_indices = @transform_4, window_bounds = array<i64: 1, 32>}, {pipeline_mode = #tpu.pipeline_mode<synchronous>, transform_indices = @transform_5, window_bounds = array<i64: 32, 32>}, {pipeline_mode = #tpu.pipeline_mode<synchronous>, transform_indices = @transform_6, window_bounds = array<i64: 1, 32>}, {pipeline_mode = #tpu.pipeline_mode<synchronous>, transform_indices = @transform_7, window_bounds = array<i64: 32, 32>}, {pipeline_mode = #tpu.pipeline_mode<synchronous>, transform_indices = @transform_8, window_bounds = array<i64: 1, 32>}, {transform_indices = @transform_9, window_bounds = array<i64: 64, 32>}]} {
    %c0 = arith.constant 0 : index
    %c0_0 = arith.constant 0 : index
    %0 = vector.load %arg1[%c0, %c0_0] : memref<64x2xf32, #tpu.memory_space<vmem>>, vector<64x2xf32>
    %c0_1 = arith.constant 0 : index
    %c0_2 = arith.constant 0 : index
    %1 = vector.load %arg3[%c0_1, %c0_2] : memref<2x32xf32, #tpu.memory_space<vmem>>, vector<2x32xf32>
    %cst = arith.constant dense<0.000000e+00> : vector<64x32xf32>
    %2 = tpu.matmul %0, %1, %cst {dimension_numbers = #tpu.dot_dimension_numbers<[1], [0], [0], [1], [0, 0, 1, 1], [], []>} : vector<64x2xf32>, vector<2x32xf32>, vector<64x32xf32> -> vector<64x32xf32>
    %c0_3 = arith.constant 0 : index
    %c0_4 = arith.constant 0 : index
    %3 = vector.load %arg2[%c0_3, %c0_4] : memref<64x30xf32, #tpu.memory_space<vmem>>, vector<64x30xf32>
    %c0_5 = arith.constant 0 : index
    %c0_6 = arith.constant 0 : index
    %4 = vector.load %arg4[%c0_5, %c0_6] : memref<30x32xf32, #tpu.memory_space<vmem>>, vector<30x32xf32>
    %cst_7 = arith.constant dense<0.000000e+00> : vector<64x32xf32>
    %5 = tpu.matmul %3, %4, %cst_7 {dimension_numbers = #tpu.dot_dimension_numbers<[1], [0], [0], [1], [0, 0, 1, 1], [], []>} : vector<64x30xf32>, vector<30x32xf32>, vector<64x32xf32> -> vector<64x32xf32>
    %6 = arith.addf %2, %5 : vector<64x32xf32>
    %c0_8 = arith.constant 0 : index
    %c0_9 = arith.constant 0 : index
    %7 = vector.load %arg5[%c0_8, %c0_9] : memref<1x32xf32, #tpu.memory_space<vmem>>, vector<1x32xf32>
    %8 = vector.broadcast %7 : vector<1x32xf32> to vector<64x32xf32>
    %9 = arith.addf %6, %8 : vector<64x32xf32>
    %cst_10 = arith.constant 0.000000e+00 : f32
    %10 = vector.broadcast %cst_10 : f32 to vector<64x32xf32>
    %11 = arith.maximumf %9, %10 : vector<64x32xf32>
    %c0_11 = arith.constant 0 : index
    %c0_12 = arith.constant 0 : index
    %12 = vector.load %arg6[%c0_11, %c0_12] : memref<32x32xf32, #tpu.memory_space<vmem>>, vector<32x32xf32>
    %c0_13 = arith.constant 0 : index
    %c0_14 = arith.constant 0 : index
    %13 = vector.load %arg7[%c0_13, %c0_14] : memref<1x32xf32, #tpu.memory_space<vmem>>, vector<1x32xf32>
    %cst_15 = arith.constant dense<0.000000e+00> : vector<64x32xf32>
    %14 = tpu.matmul %11, %12, %cst_15 {dimension_numbers = #tpu.dot_dimension_numbers<[1], [0], [0], [1], [0, 0, 1, 1], [], []>} : vector<64x32xf32>, vector<32x32xf32>, vector<64x32xf32> -> vector<64x32xf32>
    %15 = vector.broadcast %13 : vector<1x32xf32> to vector<64x32xf32>
    %16 = arith.addf %14, %15 : vector<64x32xf32>
    %cst_16 = arith.constant 0.000000e+00 : f32
    %17 = vector.broadcast %cst_16 : f32 to vector<64x32xf32>
    %18 = arith.maximumf %16, %17 : vector<64x32xf32>
    %c0_17 = arith.constant 0 : index
    %c0_18 = arith.constant 0 : index
    %19 = vector.load %arg8[%c0_17, %c0_18] : memref<32x32xf32, #tpu.memory_space<vmem>>, vector<32x32xf32>
    %c0_19 = arith.constant 0 : index
    %c0_20 = arith.constant 0 : index
    %20 = vector.load %arg9[%c0_19, %c0_20] : memref<1x32xf32, #tpu.memory_space<vmem>>, vector<1x32xf32>
    %cst_21 = arith.constant dense<0.000000e+00> : vector<64x32xf32>
    %21 = tpu.matmul %18, %19, %cst_21 {dimension_numbers = #tpu.dot_dimension_numbers<[1], [0], [0], [1], [0, 0, 1, 1], [], []>} : vector<64x32xf32>, vector<32x32xf32>, vector<64x32xf32> -> vector<64x32xf32>
    %22 = vector.broadcast %20 : vector<1x32xf32> to vector<64x32xf32>
    %23 = arith.addf %21, %22 : vector<64x32xf32>
    %cst_22 = arith.constant 0.000000e+00 : f32
    %24 = vector.broadcast %cst_22 : f32 to vector<64x32xf32>
    %25 = arith.maximumf %23, %24 : vector<64x32xf32>
    %c0_23 = arith.constant 0 : index
    %c0_24 = arith.constant 0 : index
    %26 = vector.load %arg10[%c0_23, %c0_24] : memref<64x32xf32, #tpu.memory_space<vmem>>, vector<64x32xf32>
    tpu.vector_store %arg10[%c0_23, %c0_24], %25 {strides = array<i32>} : memref<64x32xf32, #tpu.memory_space<vmem>>, vector<64x32xf32>,
    return
  }
  func.func @transform_0(%arg0: i32) -> (i32, i32) {
    %c0_i32 = arith.constant 0 : i32
    %c0_i32_0 = arith.constant 0 : i32
    return %arg0, %c0_i32 : i32, i32
  }
  func.func @transform_1(%arg0: i32) -> (i32, i32) {
    %c0_i32 = arith.constant 0 : i32
    %c0_i32_0 = arith.constant 0 : i32
    return %arg0, %c0_i32 : i32, i32
  }
  func.func @transform_2(%arg0: i32) -> (i32, i32) {
    %c0_i32 = arith.constant 0 : i32
    %c0_i32_0 = arith.constant 0 : i32
    %c0_i32_1 = arith.constant 0 : i32
    return %c0_i32, %c0_i32_0 : i32, i32
  }
  func.func @transform_3(%arg0: i32) -> (i32, i32) {
    %c0_i32 = arith.constant 0 : i32
    %c0_i32_0 = arith.constant 0 : i32
    %c0_i32_1 = arith.constant 0 : i32
    return %c0_i32, %c0_i32_0 : i32, i32
  }
  func.func @transform_4(%arg0: i32) -> (i32, i32) {
    %c0_i32 = arith.constant 0 : i32
    %c0_i32_0 = arith.constant 0 : i32
    %c0_i32_1 = arith.constant 0 : i32
    return %c0_i32, %c0_i32_0 : i32, i32
  }
  func.func @transform_5(%arg0: i32) -> (i32, i32) {
    %c0_i32 = arith.constant 0 : i32
    %c0_i32_0 = arith.constant 0 : i32
    %c0_i32_1 = arith.constant 0 : i32
    return %c0_i32, %c0_i32_0 : i32, i32
  }
  func.func @transform_6(%arg0: i32) -> (i32, i32) {
    %c0_i32 = arith.constant 0 : i32
    %c0_i32_0 = arith.constant 0 : i32
    %c0_i32_1 = arith.constant 0 : i32
    return %c0_i32, %c0_i32_0 : i32, i32
  }
  func.func @transform_7(%arg0: i32) -> (i32, i32) {
    %c0_i32 = arith.constant 0 : i32
    %c0_i32_0 = arith.constant 0 : i32
    %c0_i32_1 = arith.constant 0 : i32
    return %c0_i32, %c0_i32_0 : i32, i32
  }
  func.func @transform_8(%arg0: i32) -> (i32, i32) {
    %c0_i32 = arith.constant 0 : i32
    %c0_i32_0 = arith.constant 0 : i32
    %c0_i32_1 = arith.constant 0 : i32
    return %c0_i32, %c0_i32_0 : i32, i32
  }
  func.func @transform_9(%arg0: i32) -> (i32, i32) {
    %c0_i32 = arith.constant 0 : i32
    %c0_i32_0 = arith.constant 0 : i32
    return %arg0, %c0_i32 : i32, i32
  }
}

</mosaic_0001>

<bundles_post_ra>
// kernel: tpu_custom_call.1
= control target key start
LH: loop header
LB: loop body
LE: loop exit
PB: predicated region body
PF: predicated region fallthrough
CT: control target
= control target key end

     0   :  { %s1314_s30 = smov 0   ;;  %s1435_s0 = inlined_call_operand.vmem [shape: f32[256,2], index: 0, kind: input, shape index: {}]   ;;  %s1436_s1 = inlined_call_operand.vmem [shape: f32[256,30], index: 1, kind: input, shape index: {}]   ;;  %s1437_s2 = inlined_call_operand.vmem [shape: f32[2,32], index: 2, kind: input, shape index: {}]   ;;  %s1438_s3 = inlined_call_operand.vmem [shape: f32[30,32], index: 3, kind: input, shape index: {}]   ;;  %s1439_s4 = inlined_call_operand.vmem [shape: f32[1,32], index: 4, kind: input, shape index: {}]   ;;  %s1440_s5 = inlined_call_operand.vmem [shape: f32[32,32], index: 5, kind: input, shape index: {}]   ;;  %s1441_s6 = inlined_call_operand.vmem [shape: f32[1,32], index: 6, kind: input, shape index: {}]   ;;  %s1442_s7 = inlined_call_operand.vmem [shape: f32[32,32], index: 7, kind: input, shape index: {}]   ;;  %s1443_s8 = inlined_call_operand.vmem [shape: f32[1,32], index: 8, kind: input, shape index: {}]   ;;  %s1444_s9 = inlined_call_operand.vmem [shape: f32[256,32], index: 9, kind: output, shape index: {}]  }
   0x1 LB: > { %s1043_s10 = sadd.s32 4294967295, %s1261_s30   ;;  %p1047_p0 = scmp.ge.s32.totalorder %s1261_s30, 1  ;;  %s1261_s30 = sphi %s1314_s30, %s19_s30  }
   0x2   : > { %p299_p1 = scmp.lt.s32.totalorder %s1261_s30, 5 }
   0x4   : > { %p300_p2 = pnand %p1047_p0, %p299_p1 }
   0x5   : > { %v375_v0 = vld [vmem:[%s1438_s3] sm:$0xff] (!%p300_p2)  ;;  %v376_v1 = vld [vmem:[%s1438_s3 + $0x8] sm:$0xff] (!%p300_p2)  ;;  %v377_v2 = vld [vmem:[%s1438_s3 + $0x10] sm:$0xff] (!%p300_p2)  ;;  %vm404_vm0 = vcmask (!%p300_p2), 1045504   ;;  %s1048_s17 = sshll.u32 (!%p300_p2), %s1043_s10, 3  ;;  %vm1263_vm1 = vmmov (!%p300_p2), 1  }
   0x6   : > { %303 = sbr.rel (%p300_p2) target bundleno = 700 (0x2bc), region = 56  ;;  %v1212_v3 = vpack.c.bf16 (!%p300_p2), %v376_v1, %v375_v0  ;;  %v378_v4 = vld [vmem:[%s1438_s3 + $0x18] sm:$0x3f] (!%p300_p2)  ;;  %p341_p3 = scmp.lt.s32.totalorder (!%p300_p2), %s1048_s17, 31  ;;  %vm1334_vm2 = vmpackc.low (!%p300_p2), %vm404_vm0, %vm1263_vm1  ;;  %v670_v7 = vld [vmem:[%s1440_s5] sm:$0xff] (!%p300_p2)  ;;  %vm379_vm3 = vcmask (!%p300_p2), 244736  }
   0x7   : > { %v1216_v5 = vpack.c.bf16 (!%p300_p2), %v378_v4, %v377_v2  ;;  %v671_v8 = vld [vmem:[%s1440_s5 + $0x8] sm:$0xff] (!%p300_p2)  ;;  %v366_v10 = vld [vmem:[%s1437_s2] sm:$0x3] (!%p300_p2)  ;;  %vm538_vm4 = vcmask (!%p300_p2), 1041408   ;;  %vm513_vm5 = vcmask (!%p300_p2), 15360   ;;  %v672_v27 = vld [vmem:[%s1440_s5 + $0x10] sm:$0xff] (!%p300_p2) }
   0x8   : > { %1213 = vmatprep.subr.bf16.mxu0 (!%p300_p2), %v1212_v3  ;;  %v1222_v9 = vpack.c.bf16 (!%p300_p2), %v671_v8, %v670_v7  ;;  %v673_v28 = vld [vmem:[%s1440_s5 + $0x18] sm:$0xff] (!%p300_p2)  ;;  %v819_v30 = vld [vmem:[%s1442_s7] sm:$0xff] (!%p300_p2)  ;;  %v820_v31 = vld [vmem:[%s1442_s7 + $0x8] sm:$0xff] (!%p300_p2)  ;;  %vm681_vm6 = vcmask (!%p300_p2), 261120  }
   0x9   : > { %1215 = vmatpush3.bf16.msra.mxu0 (!%p300_p2), %v1212_v3  ;;  %v1226_v29 = vpack.c.bf16 (!%p300_p2), %v673_v28, %v672_v27  ;;  %v1230_v32 = vpack.c.bf16 (!%p300_p2), %v820_v31, %v819_v30  ;;  %v1072_v33 = vld [vmem:[%s1439_s4] ss:$0 sm:$0xff] (!%p300_p2)  ;;  %v821_v38 = vld [vmem:[%s1442_s7 + $0x10] sm:$0xff] (!%p300_p2)  ;;  %v822_v39 = vld [vmem:[%s1442_s7 + $0x18] sm:$0xff] (!%p300_p2) }
   0xa   : > { %1218 = vmatprep.subr.msk.bf16.mxu0 (!%p300_p2), %vm1334_vm2, %v1216_v5  ;;  %1223 = vmatprep.subr.bf16.mxu1 (!%p300_p2), %v1222_v9  ;;  %v1234_v45 = vpack.c.bf16 (!%p300_p2), %v822_v39, %v821_v38  ;;  %v1073_v61 = vld [vmem:[%s1441_s6] ss:$0 sm:$0xff] (!%p300_p2) }
   0xb   : > { %1225 = vmatpush3.bf16.msra.mxu1 (!%p300_p2), %v1222_v9 }
   0xc   : > { %1227 = vmatprep.subr.bf16.mxu1 (!%p300_p2), %v1226_v29 }
   0xd   : > { %s1448_s17 = smov (!%p341_p3, %s1048_s17), 31  ;;  %1221 = vmatpush3.bf16.msk.msra.mxu0 %vm1334_vm2, %v1216_v5 }
   0xe   : > { %s1346_s24 = sshll.u32 %s1448_s17, 3  ;;  %1158 = vmatprep.subr.msk.mxu0 %vm538_vm4, %v366_v10 }
   0xf   : > { %s350_s27 = scalar_lea.vmem %s1436_s1, %s1346_s24  ;;  %s344_s12 = scalar_lea.vmem %s1435_s0, %s1346_s24  ;;  %1229 = vmatpush3.bf16.msra.mxu1 %v1226_v29 }
  0x10   : > { %v367_v11 = vld [vmem:[%s350_s27] sm:$0xff]  ;;  %v368_v12 = vld [vmem:[%s350_s27 + $0x8] sm:$0xff]  ;;  %v369_v13 = vld [vmem:[%s350_s27 + $0x10] sm:$0xff]  ;;  %1231 = vmatprep.subr.bf16.mxu1 %v1230_v32  ;;  %s356_s14 = scalar_lea.vmem %s1444_s9, %s1346_s24 }
  0x11   : > { %1146 = vmatprep.mubr.msk.f32.mxu0 %vm379_vm3, %v367_v11  ;;  %v370_v14 = vld [vmem:[%s350_s27 + $0x18] sm:$0xff]  ;;  %v371_v15 = vld [vmem:[%s350_s27 + $0x20] sm:$0xff]  ;;  %v372_v16 = vld [vmem:[%s350_s27 + $0x28] sm:$0xff] }
  0x12   : > { %1147 = vmatmul.mubr.msk.f32.vlgmr.msra.gmra.mrb[0].mxu0 %vm379_vm3, %v368_v12  ;;  %v373_v17 = vld [vmem:[%s350_s27 + $0x30] sm:$0xff]  ;;  %v374_v18 = vld [vmem:[%s350_s27 + $0x38] sm:$0xff]  ;;  %v358_v19 = vld [vmem:[%s344_s12] sm:$0xff] }
  0x13   : > { %1159 = vmatpush3.msk.msra.mxu0 %vm538_vm4, %v366_v10  ;;  %1149 = vmatprep.mubr.msk.f32.mxu0 %vm379_vm3, %v369_v13  ;;  %v359_v20 = vld [vmem:[%s344_s12 + $0x8] sm:$0xff]  ;;  %v360_v21 = vld [vmem:[%s344_s12 + $0x10] sm:$0xff]  ;;  %v361_v22 = vld [vmem:[%s344_s12 + $0x18] sm:$0xff] }
  0x14   : > { %v362_v23 = vld [vmem:[%s344_s12 + $0x20] sm:$0xff]  ;;  %v363_v24 = vld [vmem:[%s344_s12 + $0x28] sm:$0xff]  ;;  %v364_v25 = vld [vmem:[%s344_s12 + $0x30] sm:$0xff] }
  0x15   : > { %v365_v26 = vld [vmem:[%s344_s12 + $0x38] sm:$0xff] }
  0x16   : > { %1150 = vmatmul.mubr.msk.f32.gmra.mrb[2].mxu0 %vm379_vm3, %v370_v14 }
  0x17   : > { %1152 = vmatprep.mubr.msk.f32.mxu0 %vm379_vm3, %v371_v15 }
  0x1a   : > { %1153 = vmatmul.mubr.msk.f32.gmra.mrb[4].mxu0 %vm379_vm3, %v372_v16 }
  0x1b   : > { %1155 = vmatprep.mubr.msk.f32.mxu0 %vm379_vm3, %v373_v17 }
  0x1e   : > { %1156 = vmatmul.mubr.msk.f32.gmra.mrb[6].mxu0 %vm379_vm3, %v374_v18 }
  0x1f   : > { %1160 = vmatprep.mubr.msk.f32.mxu0 %vm513_vm5, %v358_v19 }
  0x22   : > { %1161 = vmatmul.mubr.msk.f32.vlgmr.msra.gmra.mrb[0].mxu0 %vm513_vm5, %v359_v20 }
  0x23   : > { %1163 = vmatprep.mubr.msk.f32.mxu0 %vm513_vm5, %v360_v21 }
  0x26   : > { %1164 = vmatmul.mubr.msk.f32.gmra.mrb[2].mxu0 %vm513_vm5, %v361_v22  ;;  %v1082_v22 = vld [vmem:[%s1443_s8] ss:$0 sm:$0xff] }
  0x27   : > { %1166 = vmatprep.mubr.msk.f32.mxu0 %vm513_vm5, %v362_v23 }
  0x2a   : > { %1167 = vmatmul.mubr.msk.f32.gmra.mrb[4].mxu0 %vm513_vm5, %v363_v24 }
  0x2b   : > { %1169 = vmatprep.mubr.msk.f32.mxu0 %vm513_vm5, %v364_v25 }
  0x2e   : > { %1170 = vmatmul.mubr.msk.f32.gmra.mrb[6].mxu0 %vm513_vm5, %v365_v26 }
  0xf5   : > { %v1162_v34 = vpop.f32.mrb[0].mxu0 }
  0xf6   : > { %v655_v35 = vadd.f32 %v1162_v34, %v1072_v33  ;;  %v608_v36 = vpop.f32.mrb[1].mxu0 }
  0xf7   : > { %v654_v37 = vadd.f32 %v1072_v33, %v608_v36 }
  0xf8   : > { %v663_v42 = vmax.f32 %v655_v35, 0.0 }
  0xf9   : > { %v662_v40 = vmax.f32 %v654_v37, 0.0  ;;  %v1165_v41 = vpop.f32.mrb[2].mxu0 }
  0xfa   : > { %v657_v43 = vadd.f32 %v1165_v41, %v1072_v33  ;;  %v618_v44 = vpop.f32.mrb[3].mxu0 }
  0xfb   : > { %v656_v46 = vadd.f32 %v1072_v33, %v618_v44  ;;  %1180 = vmatprep.mubr.msk.f32.mxu1 %vm681_vm6, %v662_v40 }
  0xfc   : > { %1181 = vmatmul.mubr.msk.f32.vlgmr.msra.gmra.mrb[0].mxu1 %vm681_vm6, %v663_v42  ;;  %v665_v49 = vmax.f32 %v657_v43, 0.0 }
  0xfd   : > { %v664_v47 = vmax.f32 %v656_v46, 0.0  ;;  %v1168_v48 = vpop.f32.mrb[4].mxu0  ;;  %1233 = vmatpush3.bf16.msra.mxu1 %v1230_v32 }
  0xfe   : > { %v659_v50 = vadd.f32 %v1168_v48, %v1072_v33  ;;  %v628_v51 = vpop.f32.mrb[5].mxu0  ;;  %1235 = vmatprep.subr.bf16.mxu1 %v1234_v45 }
  0xff   : > { %v658_v52 = vadd.f32 %v1072_v33, %v628_v51  ;;  %1183 = vmatprep.mubr.msk.f32.mxu1 %vm681_vm6, %v664_v47 }
 0x100   : > { %1184 = vmatmul.mubr.msk.f32.gmra.mrb[2].mxu1 %vm681_vm6, %v665_v49  ;;  %v667_v55 = vmax.f32 %v659_v50, 0.0 }
 0x101   : > { %v666_v53 = vmax.f32 %v658_v52, 0.0  ;;  %v1171_v54 = vpop.f32.mrb[6].mxu0  ;;  %1237 = vmatpush3.bf16.msra.mxu1 %v1234_v45 }
 0x102   : > { %v661_v56 = vadd.f32 %v1171_v54, %v1072_v33  ;;  %v638_v57 = vpop.f32.mrb[7].mxu0 }
 0x103   : > { %v660_v58 = vadd.f32 %v1072_v33, %v638_v57  ;;  %1186 = vmatprep.mubr.msk.f32.mxu1 %vm681_vm6, %v666_v53 }
 0x104   : > { %1187 = vmatmul.mubr.msk.f32.gmra.mrb[4].mxu1 %vm681_vm6, %v667_v55  ;;  %v669_v60 = vmax.f32 %v661_v56, 0.0 }
 0x105   : > { %v668_v59 = vmax.f32 %v660_v58, 0.0 }
 0x107   : > { %1189 = vmatprep.mubr.msk.f32.mxu1 %vm681_vm6, %v668_v59 }
 0x108   : > { %1190 = vmatmul.mubr.msk.f32.gmra.mrb[6].mxu1 %vm681_vm6, %v669_v60 }
 0x1cf   : > { %v1182_v62 = vpop.f32.mrb[0].mxu1 }
 0x1d0   : > { %v778_v63 = vadd.f32 %v1182_v62, %v1073_v61  ;;  %v772_v0 = vpop.f32.mrb[1].mxu1 }
 0x1d1   : > { %v773_v1 = vadd.f32 %v1073_v61, %v772_v0 }
 0x1d2   : > { %v812_v4 = vmax.f32 %v778_v63, 0.0 }
 0x1d3   : > { %v811_v2 = vmax.f32 %v773_v1, 0.0  ;;  %v1185_v3 = vpop.f32.mrb[2].mxu1 }
 0x1d4   : > { %v788_v5 = vadd.f32 %v1185_v3, %v1073_v61  ;;  %v782_v6 = vpop.f32.mrb[3].mxu1 }
 0x1d5   : > { %v783_v7 = vadd.f32 %v1073_v61, %v782_v6  ;;  %1200 = vmatprep.mubr.msk.f32.mxu1 %vm681_vm6, %v811_v2 }
 0x1d6   : > { %1201 = vmatmul.mubr.msk.f32.vlgmr.msra.gmra.mrb[8].mxu1 %vm681_vm6, %v812_v4  ;;  %v814_v10 = vmax.f32 %v788_v5, 0.0 }
 0x1d7   : > { %v813_v8 = vmax.f32 %v783_v7, 0.0  ;;  %v1188_v9 = vpop.f32.mrb[4].mxu1 }
 0x1d8   : > { %v798_v11 = vadd.f32 %v1188_v9, %v1073_v61  ;;  %v792_v12 = vpop.f32.mrb[5].mxu1 }
 0x1d9   : > { %v793_v13 = vadd.f32 %v1073_v61, %v792_v12  ;;  %1203 = vmatprep.mubr.msk.f32.mxu1 %vm681_vm6, %v813_v8 }
 0x1da   : > { %1204 = vmatmul.mubr.msk.f32.gmra.mrb[10].mxu1 %vm681_vm6, %v814_v10  ;;  %v816_v16 = vmax.f32 %v798_v11, 0.0 }
 0x1db   : > { %v815_v14 = vmax.f32 %v793_v13, 0.0  ;;  %v1191_v15 = vpop.f32.mrb[6].mxu1 }
 0x1dc   : > { %v808_v17 = vadd.f32 %v1191_v15, %v1073_v61  ;;  %v802_v18 = vpop.f32.mrb[7].mxu1 }
 0x1dd   : > { %v803_v19 = vadd.f32 %v1073_v61, %v802_v18  ;;  %1206 = vmatprep.mubr.msk.f32.mxu1 %vm681_vm6, %v815_v14 }
 0x1de   : > { %1207 = vmatmul.mubr.msk.f32.gmra.mrb[12].mxu1 %vm681_vm6, %v816_v16  ;;  %v818_v21 = vmax.f32 %v808_v17, 0.0 }
 0x1df   : > { %v817_v20 = vmax.f32 %v803_v19, 0.0 }
 0x1e1   : > { %1209 = vmatprep.mubr.msk.f32.mxu1 %vm681_vm6, %v817_v20 }
 0x1e2   : > { %1210 = vmatmul.mubr.msk.f32.gmra.mrb[14].mxu1 %vm681_vm6, %v818_v21 }
 0x2a9   : > { %v1202_v23 = vpop.f32.mrb[8].mxu1 }
 0x2aa   : > { %v926_v24 = vadd.f32 %v1202_v23, %v1082_v22  ;;  %v920_v25 = vpop.f32.mrb[9].mxu1 }
 0x2ab   : > { %v921_v26 = vadd.f32 %v1082_v22, %v920_v25 }
 0x2ac   : > { %v960_v27 = vmax.f32 %v926_v24, 0.0 }
 0x2ad   : > { %v959_v28 = vmax.f32 %v921_v26, 0.0  ;;  %v1205_v29 = vpop.f32.mrb[10].mxu1 }
 0x2ae   : > { %968 = vst.msk [vmem:[%s356_s14 + $0x8] sm:$0xff] %vm681_vm6, %v960_v27  ;;  %v936_v30 = vadd.f32 %v1205_v29, %v1082_v22  ;;  %v930_v31 = vpop.f32.mrb[11].mxu1 }
 0x2af   : > { %967 = vst.msk [vmem:[%s356_s14] sm:$0xff] %vm681_vm6, %v959_v28  ;;  %v931_v32 = vadd.f32 %v1082_v22, %v930_v31 }
 0x2b0   : > { %v962_v33 = vmax.f32 %v936_v30, 0.0 }
 0x2b1   : > { %v961_v34 = vmax.f32 %v931_v32, 0.0  ;;  %v1208_v35 = vpop.f32.mrb[12].mxu1 }
 0x2b2   : > { %970 = vst.msk [vmem:[%s356_s14 + $0x18] sm:$0xff] %vm681_vm6, %v962_v33  ;;  %v946_v36 = vadd.f32 %v1208_v35, %v1082_v22  ;;  %v940_v37 = vpop.f32.mrb[13].mxu1 }
 0x2b3   : > { %969 = vst.msk [vmem:[%s356_s14 + $0x10] sm:$0xff] %vm681_vm6, %v961_v34  ;;  %v941_v38 = vadd.f32 %v1082_v22, %v940_v37 }
 0x2b4   : > { %v964_v39 = vmax.f32 %v946_v36, 0.0 }
 0x2b5   : > { %v963_v40 = vmax.f32 %v941_v38, 0.0  ;;  %v1211_v41 = vpop.f32.mrb[14].mxu1 }
 0x2b6   : > { %972 = vst.msk [vmem:[%s356_s14 + $0x28] sm:$0xff] %vm681_vm6, %v964_v39  ;;  %v956_v42 = vadd.f32 %v1211_v41, %v1082_v22  ;;  %v950_v43 = vpop.f32.mrb[15].mxu1 }
 0x2b7   : > { %971 = vst.msk [vmem:[%s356_s14 + $0x20] sm:$0xff] %vm681_vm6, %v963_v40  ;;  %v951_v44 = vadd.f32 %v1082_v22, %v950_v43 }
 0x2b8   : > { %v966_v45 = vmax.f32 %v956_v42, 0.0 }
 0x2b9   : > { %v965_v46 = vmax.f32 %v951_v44, 0.0 }
 0x2ba   : > { %974 = vst.msk [vmem:[%s356_s14 + $0x38] sm:$0xff] %vm681_vm6, %v966_v45 }
 0x2bb   : > { %973 = vst.msk [vmem:[%s356_s14 + $0x30] sm:$0xff] %vm681_vm6, %v965_v46 }
 0x2bc PF: > { %s19_s30 = sadd.s32 1, %s1261_s30  }
 0x2bd   : > { %p16_p4 = scmp.ge.s32.totalorder %s19_s30, 6  }
 0x2bf   :  { %18 = sbr.rel (!%p16_p4) target bundleno = 1 (0x1), region = 89 }

</bundles_post_ra>
